<compile_context>
chip_gen: v5e
topology: v5e:2x2
jax: 0.10.0
libtpu: 0.0.40
codegen_flags: <defaults>
</compile_context>

<pallas_src>
import jax
import jax.numpy as jnp
from jax.experimental import pallas as pl
from jax.experimental.pallas import tpu as pltpu

_MARGIN = 0.002
_PW_EPS = 1e-6                            # F.pairwise_distance default eps
_LANE = 128
_VMEM_WORKSET_BYTES = 20 * 1024 * 1024    # pipelined working-set budget (all buffers)
_VMEM_LIMIT_BYTES = 32 * 1024 * 1024      # explicit scoped-VMEM limit (safe on v5e/v6e/v7x)
_MAX_TILE_ROWS = 32768


def _sqdist_kernel(o1_ref, o2_ref, sq_ref):
    """Per-row squared L2 distance: sq[i] = sum_d (o1[i,d] - o2[i,d] + eps)^2.

    Blocks are row-major (TN, D) in the inputs' native dtype; upcast to f32 in
    VMEM (VPU slot has huge slack), reduce over the lane axis (XLU), and store
    the (TN, 1) column of squared distances.  Padded rows of a ragged trailing
    block produce garbage that the masked store / wrapper slice drops.
    """
    diff = (o1_ref[...].astype(jnp.float32)
            - o2_ref[...].astype(jnp.float32)
            + _PW_EPS)                                    # matches torch's +eps
    sq_ref[...] = jnp.sum(diff * diff, axis=-1, keepdims=True)


def _sublane_multiple(dtype) -> int:
    # Sublane packing: f32 -> 8 rows/vreg, bf16/f16 -> 16, 8-bit -> 32.
    return {4: 8, 2: 16, 1: 32}.get(jnp.dtype(dtype).itemsize, 8)


def _pick_tile_rows(n, d, dtype):
    """Largest row tile whose double-buffered VMEM working set fits the budget."""
    itemsize = jnp.dtype(dtype).itemsize
    sub = _sublane_multiple(dtype)
    d_lanes = pl.cdiv(d, _LANE) * _LANE
    # Per-row VMEM cost across all live pipeline buffers:
    #   2 inputs x 2 buffers x (D padded to 128 lanes) x itemsize
    # + 1 output x 2 buffers x (1 padded to 128 lanes)  x 4 bytes (f32)
    per_row = 4 * d_lanes * itemsize + 2 * _LANE * 4
    tn = _VMEM_WORKSET_BYTES // per_row
    tn = min(tn, _MAX_TILE_ROWS)
    tn = (tn // _LANE) * _LANE            # multiple of 128 => multiple of sub
    tn = max(tn, sub)
    tn = min(tn, pl.cdiv(n, sub) * sub)   # never bigger than the (rounded) batch
    return tn


def my_loss(output1, output2, y_test, *, margin=_MARGIN, tile_n=None):
    """output1, output2: (N, D) float; y_test: (N,) float. Returns (N,) float32."""
    output1 = jnp.asarray(output1)
    output2 = jnp.asarray(output2)
    if output1.dtype not in (jnp.float32, jnp.bfloat16, jnp.float16):
        output1 = output1.astype(jnp.float32)
    if output2.dtype != output1.dtype:
        output2 = output2.astype(output1.dtype)
    y = jnp.asarray(y_test, jnp.float32)

    n, d = output1.shape
    sub = _sublane_multiple(output1.dtype)
    if tile_n is None:
        tn = _pick_tile_rows(n, d, output1.dtype)
    else:
        tn = max(sub, pl.cdiv(int(tile_n), sub) * sub)   # guard: sublane-aligned
        tn = min(tn, pl.cdiv(n, sub) * sub)
    n_tiles = pl.cdiv(n, tn)

    itemsize = jnp.dtype(output1.dtype).itemsize
    cost = pl.CostEstimate(flops=3 * n * d, transcendentals=0,
                           bytes_accessed=2 * n * d * itemsize + n * 4)

    sq = pl.pallas_call(
        _sqdist_kernel,
        grid=(n_tiles,),
        in_specs=[
            pl.BlockSpec((tn, d), lambda i: (i, 0)),
            pl.BlockSpec((tn, d), lambda i: (i, 0)),
        ],
        out_specs=pl.BlockSpec((tn, 1), lambda i: (i, 0)),
        out_shape=jax.ShapeDtypeStruct((n, 1), jnp.float32),
        compiler_params=pltpu.CompilerParams(
            dimension_semantics=("parallel",),
            vmem_limit_bytes=_VMEM_LIMIT_BYTES),
        cost_estimate=cost,
    )(output1, output2)

    sq = sq[:, 0]                                        # (N,) squared distances
    # Trivial O(N) epilogue: global min -> hinge -> elementwise combine.  XLA
    # fuses this into one pass over N floats; a second pallas_call here would be
    # pure launch/step overhead.  sqrt(min(sq)) == min(dist) by monotonicity.
    hinge = jnp.maximum(margin - jnp.sqrt(jnp.min(sq)), 0.0)
    return y * (hinge * hinge) + (1.0 - y) * sq


def _reference(output1, output2, y_test, margin=_MARGIN):
    # Pure-JAX mirror of the PyTorch forward (f32 math).
    o1 = jnp.asarray(output1, jnp.float32)
    o2 = jnp.asarray(output2, jnp.float32)
    diff = o1 - o2 + _PW_EPS
    dist = jnp.sqrt(jnp.sum(diff * diff, axis=-1))
    hinge = jnp.maximum(0.0, jnp.max(margin - dist))
    return y_test * hinge**2 + (1.0 - y_test) * dist**2


if __name__ == "__main__":
    key = jax.random.PRNGKey(0)
    k1, k2, k3 = jax.random.split(key, 3)

    # Small demo shapes consistent with the module (paired embeddings + labels).
    N, D = 8, 32
    o1 = jax.random.normal(k1, (N, D), dtype=jnp.float32)
    o2 = jax.random.normal(k2, (N, D), dtype=jnp.float32)
    y = jax.random.bernoulli(k3, 0.5, (N,)).astype(jnp.float32)

    loss = jax.block_until_ready(my_loss(o1, o2, y))
    ref = _reference(o1, o2, y)
    assert loss.shape == (N,)
    assert jnp.allclose(loss, ref, rtol=1e-5, atol=1e-5), (loss, ref)

    # Hinge-active path (dist < margin): identical inputs.
    loss2 = jax.block_until_ready(my_loss(o1, o1, y))
    ref2 = _reference(o1, o1, y)
    assert jnp.allclose(loss2, ref2, rtol=1e-5, atol=1e-9), (loss2, ref2)

    # Ragged / unaligned path: N not a multiple of the tile, D not a multiple of 128.
    N2, D2 = 1000, 45
    k4, k5, k6 = jax.random.split(jax.random.PRNGKey(1), 3)
    o1b = jax.random.normal(k4, (N2, D2), dtype=jnp.float32)
    o2b = jax.random.normal(k5, (N2, D2), dtype=jnp.float32)
    yb = jax.random.bernoulli(k6, 0.5, (N2,)).astype(jnp.float32)
    loss3 = jax.block_until_ready(my_loss(o1b, o2b, yb, tile_n=256))
    ref3 = _reference(o1b, o2b, yb)
    assert loss3.shape == (N2,)
    assert jnp.allclose(loss3, ref3, rtol=1e-5, atol=1e-4), (loss3, ref3)

    # Native-dtype path: bf16 inputs streamed without an HBM-side f32 upcast.
    N3, D3 = 3000, 64
    k7, k8, k9 = jax.random.split(jax.random.PRNGKey(2), 3)
    o1c = jax.random.normal(k7, (N3, D3), dtype=jnp.bfloat16)
    o2c = jax.random.normal(k8, (N3, D3), dtype=jnp.bfloat16)
    yc = jax.random.bernoulli(k9, 0.5, (N3,)).astype(jnp.float32)
    loss4 = jax.block_until_ready(my_loss(o1c, o2c, yc))
    ref4 = _reference(o1c, o2c, yc)
    assert loss4.shape == (N3,)
    assert jnp.allclose(loss4, ref4, rtol=1e-5, atol=1e-4), (loss4, ref4)

    print("KERNEL_OK")
</pallas_src>

<mosaic_0001>
module attributes {stable_mosaic.version = 11 : i64} {
  func.func @_sqdist_kernel(%arg0: i32, %arg1: memref<8x32xf32, #tpu.memory_space<vmem>>, %arg2: memref<8x32xf32, #tpu.memory_space<vmem>>, %arg3: memref<8x1xf32, #tpu.memory_space<vmem>>) attributes {dimension_semantics = [#tpu.dimension_semantics<parallel>], iteration_bounds = array<i64: 1>, scalar_prefetch = 0 : i64, scratch_operands = 0 : i64, tpu.core_type = #tpu.core_type<tc>, window_params = [{transform_indices = @transform_0, window_bounds = array<i64: 8, 32>}, {transform_indices = @transform_1, window_bounds = array<i64: 8, 32>}, {transform_indices = @transform_2, window_bounds = array<i64: 8, 1>}]} {
    %c0 = arith.constant 0 : index
    %c0_0 = arith.constant 0 : index
    %0 = vector.load %arg1[%c0, %c0_0] : memref<8x32xf32, #tpu.memory_space<vmem>>, vector<8x32xf32>
    %c0_1 = arith.constant 0 : index
    %c0_2 = arith.constant 0 : index
    %1 = vector.load %arg2[%c0_1, %c0_2] : memref<8x32xf32, #tpu.memory_space<vmem>>, vector<8x32xf32>
    %2 = arith.subf %0, %1 : vector<8x32xf32>
    %cst = arith.constant 9.99999997E-7 : f32
    %3 = vector.broadcast %cst : f32 to vector<8x32xf32>
    %4 = arith.addf %2, %3 : vector<8x32xf32>
    %5 = arith.mulf %4, %4 : vector<8x32xf32>
    %cst_3 = arith.constant dense<0.000000e+00> : vector<8xf32>
    %6 = vector.multi_reduction <add>, %5, %cst_3 [1] : vector<8x32xf32> to vector<8xf32>
    %7 = vector.shape_cast %6 : vector<8xf32> to vector<8x1xf32>
    %c0_4 = arith.constant 0 : index
    %c0_5 = arith.constant 0 : index
    %8 = vector.load %arg3[%c0_4, %c0_5] : memref<8x1xf32, #tpu.memory_space<vmem>>, vector<8x1xf32>
    tpu.vector_store %arg3[%c0_4, %c0_5], %7 {strides = array<i32>} : memref<8x1xf32, #tpu.memory_space<vmem>>, vector<8x1xf32>,
    return
  }
  func.func @transform_0(%arg0: i32) -> (i32, i32) {
    %c0_i32 = arith.constant 0 : i32
    %c0_i32_0 = arith.constant 0 : i32
    return %arg0, %c0_i32 : i32, i32
  }
  func.func @transform_1(%arg0: i32) -> (i32, i32) {
    %c0_i32 = arith.constant 0 : i32
    %c0_i32_0 = arith.constant 0 : i32
    return %arg0, %c0_i32 : i32, i32
  }
  func.func @transform_2(%arg0: i32) -> (i32, i32) {
    %c0_i32 = arith.constant 0 : i32
    %c0_i32_0 = arith.constant 0 : i32
    return %arg0, %c0_i32 : i32, i32
  }
}

</mosaic_0001>

<bundles_post_ra>
// kernel: tpu_custom_call.1
= control target key start
LH: loop header
LB: loop body
LE: loop exit
PB: predicated region body
PF: predicated region fallthrough
CT: control target
= control target key end

     0   :  { %7 = vsyncpa [#allocation3], 0  ;;  %s136_s0 = inlined_call_operand.hbm [shape: f32[8,32], index: 0, kind: input, shape index: {}]   ;;  %s137_s1 = inlined_call_operand.hbm [shape: f32[8,32], index: 1, kind: input, shape index: {}]   ;;  %s138_s2 = inlined_call_operand.vmem [shape: f32[8,1], index: 2, kind: output, shape index: {}]  }
   0x1   :  { %s14_s11 = sshll.u32 %s136_s0, 4  ;;  %s15_s11 = int_to_ptr.hbm [resolvable:$true] %s14_s11 }
   0x2   :  { %8 = vsyncpa [#allocation5], 0  ;;  %s110_s12 = smov [#allocation2]   ;;  %s25_s16 = sshll.u32 %s137_s1, 4  ;;  %s26_s16 = int_to_ptr.hbm [resolvable:$true] %s25_s16 }
   0x3   :  { %s16_s13 = sshll.u32 %s110_s12, 4  ;;  %s111_s17 = smov [#allocation4]   ;;  %s17_s13 = int_to_ptr.vmem [resolvable:$true] %s16_s13 }
   0x4   :  { %19 = dma.hbm_to_vmem [thread:$0]  %s15_s11, 128, %s17_s13, [#allocation3]  }
   0x5   :  { %s27_s18 = sshll.u32 %s111_s17, 4  ;;  %s28_s18 = int_to_ptr.vmem [resolvable:$true] %s27_s18 }
   0x6   :  { %30 = dma.hbm_to_vmem [thread:$0]  %s26_s16, 128, %s28_s18, [#allocation5]  }
   0x7   :  { %106 = dma.done.wait [#allocation3], 128  }
   0x8   :  { %107 = vsyncadd [#allocation3], 4294967168 }
   0x9   :  { %108 = dma.done.wait [#allocation5], 128  }
   0xa   :  { %109 = vsyncadd [#allocation5], 4294967168  ;;  %v39_v0 = vld [vmem:[#allocation2] sm:$0xff]  ;;  %v40_v1 = vld [vmem:[#allocation4] sm:$0xff]  ;;  %vm44_vm0 = vcmask 261120   ;;  %vm48_vm1 = vcmask 7168  }
   0xb   :  { %v41_v2 = vsub.f32 %v39_v0, %v40_v1 }
   0xd   :  { %v42_v3 = vadd.f32 1e-06, %v41_v2 }
   0xf   :  { %v43_v4 = vmul.f32 %v42_v3, %v42_v3 }
  0x11   :  { %v45_v5 = vsel %vm44_vm0, %v43_v4, 0.0 }
  0x12   :  { %46 = vadd.xlane.f32.xlu0 %v45_v5 }
  0x85   :  { %v47_v6 = vpop.xlane.xlu0 %46 }
  0x86   :  { %49 = vst.msk [vmem:[%s138_s2] sm:$0xff] %vm48_vm1, %v47_v6 }
  0x87   :  { %54 = vsyncpa [#allocation3], 1 }
  0x88   :  { %55 = vsyncpa [#allocation5], 1 }

</bundles_post_ra>
